<compile_context>
chip_gen: v7x
topology: tpu7x:2x2x1
jax: 0.10.0
libtpu: 0.0.40
codegen_flags: <defaults>
</compile_context>

<pallas_src>
import jax
import jax.numpy as jnp
from jax.experimental import pallas as pl
from jax.experimental.pallas import tpu as pltpu


NUM_LAYERS = 5
EMBED_DIM = 128      # small-shape stand-in for the module default of 256
NUM_EDGES = 16
NEG_SLOPE = 0.01     # F.leaky_relu default


def _leaky_relu(x):
    return jnp.where(x > 0, x, NEG_SLOPE * x)


def _layer_math(h_bf, adj_bf, wk, bk, w1k, b1k, w2k, b2k, w3k, b3k):
    """One GNN layer + MLP score head.

    Shared between the Pallas kernel (stacked [2E, D] operands, block-diag
    adjacency) and the pure-JAX reference (per-stream operands) so the dtype
    flow (bf16 matmul inputs, f32 accumulation) is identical in both.

    Returns (new activation in bf16, |score| in f32 with shape [rows, 1]).
    """
    f32 = jnp.float32
    bf16 = jnp.bfloat16
    # h <- leaky_relu((adj @ h) @ W + b)
    agg = jnp.dot(adj_bf, h_bf, preferred_element_type=f32)
    h = _leaky_relu(
        jnp.dot(agg.astype(bf16), wk, preferred_element_type=f32)
        + bk.astype(f32))
    # MLP head: Linear -> tanh -> Linear -> tanh -> Linear(D, 1) -> abs
    z = jnp.tanh(
        jnp.dot(h.astype(bf16), w1k, preferred_element_type=f32)
        + b1k.astype(f32))
    z = jnp.tanh(
        jnp.dot(z.astype(bf16), w2k, preferred_element_type=f32)
        + b2k.astype(f32))
    # Linear(D, 1) as elementwise multiply + lane reduction (XLU, no MXU push).
    s = jnp.abs(jnp.sum(z * w3k.astype(f32), axis=-1, keepdims=True)
                + b3k.astype(f32))
    return h.astype(bf16), s


def edge_gnn_kernel(x2_ref, adj2_ref,
                    w_ref, b_ref,
                    w1_ref, b1_ref, w2_ref, b2_ref, w3_ref, b3_ref,
                    out_ref,
                    h_sc, s_sc):
    """One grid step = one GNN layer on the stacked [2E, D] activation.

    x2_ref:   [2E, D]     stacked (degree; weight) edge features, bf16
    adj2_ref: [2E, 2E]    block-diag(adj_degree, adj_weight), bf16
    w_ref:    [1, D, D]   this layer's GNN weight ([in, out]), bf16
    b_ref:    [1, 1, D]
    w1_ref:   [1, D, D]   MLP linear-1 weight, bf16
    b1_ref:   [1, 1, D]
    w2_ref:   [1, D, D]   MLP linear-2 weight, bf16
    b2_ref:   [1, 1, D]
    w3_ref:   [1, 1, D]   MLP linear-3 (D -> 1) weight row, bf16
    b3_ref:   [1, 1, 1]
    out_ref:  [E, 1]      edge importance scores, f32
    h_sc:     [2E, D]     bf16 scratch — activation carried across layers
    s_sc:     [2E, 1]     f32 scratch  — per-stream |score| accumulator
    """
    k = pl.program_id(0)

    @pl.when(k == 0)
    def _init():
        h_sc[...] = x2_ref[...]
        s_sc[...] = jnp.zeros_like(s_sc)

    h_new, s = _layer_math(h_sc[...], adj2_ref[...],
                           w_ref[0], b_ref[0],
                           w1_ref[0], b1_ref[0],
                           w2_ref[0], b2_ref[0],
                           w3_ref[0], b3_ref[0])
    h_sc[...] = h_new
    s_sc[...] = s_sc[...] + s

    @pl.when(k == pl.num_programs(0) - 1)
    def _finalize():
        e = out_ref.shape[0]
        s_all = s_sc[...]
        out_ref[...] = s_all[:e, :] * s_all[e:, :]   # s_degree_sum * s_weight_sum


def edge_gnn_forward(edge_features, adj_degree, adj_weight, params):
    (w, b, w1, b1, w2, b2, w3, b3) = params
    e, d = edge_features.shape
    num_layers = w.shape[0]
    bf16 = jnp.bfloat16

    # Stack the two streams; build block-diagonal adjacency once in the wrapper.
    x2 = jnp.concatenate([edge_features, edge_features], axis=0).astype(bf16)
    adj2 = jnp.zeros((2 * e, 2 * e), bf16)
    adj2 = adj2.at[:e, :e].set(adj_degree.astype(bf16))
    adj2 = adj2.at[e:, e:].set(adj_weight.astype(bf16))

    per_layer = lambda blk: pl.BlockSpec(blk, lambda k: (k, 0, 0))
    resident2d = lambda blk: pl.BlockSpec(blk, lambda k: (0, 0))

    grid_spec = pltpu.PrefetchScalarGridSpec(
        num_scalar_prefetch=0,
        grid=(num_layers,),
        in_specs=[
            resident2d((2 * e, d)),          # x2 (only consumed at k == 0)
            resident2d((2 * e, 2 * e)),      # block-diag adjacency (reused)
            per_layer((1, d, d)),            # w
            per_layer((1, 1, d)),            # b
            per_layer((1, d, d)),            # w1
            per_layer((1, 1, d)),            # b1
            per_layer((1, d, d)),            # w2
            per_layer((1, 1, d)),            # b2
            per_layer((1, 1, d)),            # w3
            per_layer((1, 1, 1)),            # b3
        ],
        out_specs=pl.BlockSpec((e, 1), lambda k: (0, 0)),
        scratch_shapes=[
            pltpu.VMEM((2 * e, d), bf16),        # h carry
            pltpu.VMEM((2 * e, 1), jnp.float32),  # score accumulator
        ],
    )
    # TODO(synk): if many graphs are scored at once, add a leading "parallel"
    # graph axis to the grid so v7x's two TensorCores are both used.
    return pl.pallas_call(
        edge_gnn_kernel,
        out_shape=jax.ShapeDtypeStruct((e, 1), jnp.float32),
        grid_spec=grid_spec,
        compiler_params=pltpu.CompilerParams(
            dimension_semantics=("arbitrary",)),
    )(x2, adj2, w, b, w1, b1, w2, b2, w3, b3)


def init_params(key, embedding_dim=EMBED_DIM, num_layers=NUM_LAYERS):
    """Deterministic synthetic parameters (PyTorch-Linear fan-in scale), bf16."""
    d = embedding_dim
    ks = jax.random.split(key, 8)
    scale = 1.0 / jnp.sqrt(jnp.float32(d))
    u = lambda k, shp: jax.random.uniform(k, shp, jnp.float32, -scale, scale
                                          ).astype(jnp.bfloat16)
    w = u(ks[0], (num_layers, d, d))       # GNN weight, [in, out]
    b = u(ks[1], (num_layers, 1, d))
    w1 = u(ks[2], (num_layers, d, d))      # MLP linear 1, [in, out]
    b1 = u(ks[3], (num_layers, 1, d))
    w2 = u(ks[4], (num_layers, d, d))      # MLP linear 2, [in, out]
    b2 = u(ks[5], (num_layers, 1, d))
    w3 = u(ks[6], (num_layers, 1, d))      # MLP linear 3 (D -> 1), weight row
    b3 = u(ks[7], (num_layers, 1, 1))
    return (w, b, w1, b1, w2, b2, w3, b3)


def edge_gnn_reference(edge_features, adj_degree, adj_weight, params):
    """Pure-JAX reference mirroring the PyTorch forward (same bf16 dtype flow)."""
    (w, b, w1, b1, w2, b2, w3, b3) = params
    bf16 = jnp.bfloat16
    e = edge_features.shape[0]
    h_d = edge_features.astype(bf16)
    h_w = edge_features.astype(bf16)
    a_d = adj_degree.astype(bf16)
    a_w = adj_weight.astype(bf16)
    s_d = jnp.zeros((e, 1), jnp.float32)
    s_w = jnp.zeros((e, 1), jnp.float32)
    for k in range(w.shape[0]):
        h_d, sd = _layer_math(h_d, a_d, w[k], b[k], w1[k], b1[k],
                              w2[k], b2[k], w3[k], b3[k])
        h_w, sw = _layer_math(h_w, a_w, w[k], b[k], w1[k], b1[k],
                              w2[k], b2[k], w3[k], b3[k])
        s_d = s_d + sd
        s_w = s_w + sw
    return s_d * s_w


if __name__ == "__main__":
    key = jax.random.PRNGKey(0)
    k_feat, k_adj_d, k_adj_w, k_params = jax.random.split(key, 4)

    edge_features = jax.random.normal(k_feat, (NUM_EDGES, EMBED_DIM), jnp.float32)
    adj_degree = jax.random.uniform(k_adj_d, (NUM_EDGES, NUM_EDGES), jnp.float32)
    adj_weight = jax.random.uniform(k_adj_w, (NUM_EDGES, NUM_EDGES), jnp.float32)
    # Normalize adjacency rows so repeated propagation stays numerically tame.
    adj_degree = adj_degree / jnp.sum(adj_degree, axis=1, keepdims=True)
    adj_weight = adj_weight / jnp.sum(adj_weight, axis=1, keepdims=True)

    params = init_params(k_params)

    out = edge_gnn_forward(edge_features, adj_degree, adj_weight, params)
    out = jax.block_until_ready(out)

    ref = edge_gnn_reference(edge_features, adj_degree, adj_weight, params)
    assert out.shape == (NUM_EDGES, 1)
    assert jnp.allclose(out, ref, atol=5e-3, rtol=5e-3), (
        f"max abs diff = {jnp.max(jnp.abs(out - ref))}")

    print("KERNEL_OK")
</pallas_src>

<mosaic_0001>
module attributes {stable_mosaic.version = 11 : i64} {
  func.func @edge_gnn_kernel(%arg0: i32, %arg1: memref<32x128xbf16, #tpu.memory_space<vmem>>, %arg2: memref<32x32xbf16, #tpu.memory_space<vmem>>, %arg3: memref<1x128x128xbf16, #tpu.memory_space<vmem>>, %arg4: memref<1x1x128xbf16, #tpu.memory_space<vmem>>, %arg5: memref<1x128x128xbf16, #tpu.memory_space<vmem>>, %arg6: memref<1x1x128xbf16, #tpu.memory_space<vmem>>, %arg7: memref<1x128x128xbf16, #tpu.memory_space<vmem>>, %arg8: memref<1x1x128xbf16, #tpu.memory_space<vmem>>, %arg9: memref<1x1x128xbf16, #tpu.memory_space<vmem>>, %arg10: memref<1x1x1xbf16, #tpu.memory_space<vmem>>, %arg11: memref<16x1xf32, #tpu.memory_space<vmem>>, %arg12: memref<32x128xbf16, #tpu.memory_space<vmem>>, %arg13: memref<32x1xf32, #tpu.memory_space<vmem>>) attributes {dimension_semantics = [#tpu.dimension_semantics<arbitrary>], iteration_bounds = array<i64: 5>, scalar_prefetch = 0 : i64, scratch_operands = 2 : i64, tpu.core_type = #tpu.core_type<tc>, window_params = [{pipeline_mode = #tpu.pipeline_mode<synchronous>, transform_indices = @transform_0, window_bounds = array<i64: 32, 128>}, {pipeline_mode = #tpu.pipeline_mode<synchronous>, transform_indices = @transform_1, window_bounds = array<i64: 32, 32>}, {transform_indices = @transform_2, window_bounds = array<i64: 1, 128, 128>}, {transform_indices = @transform_3, window_bounds = array<i64: 1, 1, 128>}, {transform_indices = @transform_4, window_bounds = array<i64: 1, 128, 128>}, {transform_indices = @transform_5, window_bounds = array<i64: 1, 1, 128>}, {transform_indices = @transform_6, window_bounds = array<i64: 1, 128, 128>}, {transform_indices = @transform_7, window_bounds = array<i64: 1, 1, 128>}, {transform_indices = @transform_8, window_bounds = array<i64: 1, 1, 128>}, {transform_indices = @transform_9, window_bounds = array<i64: 1, 1, 1>}, {pipeline_mode = #tpu.pipeline_mode<synchronous>, transform_indices = @transform_10, window_bounds = array<i64: 16, 1>}]} {
    %c0_i32 = arith.constant 0 : i32
    %0 = arith.cmpi eq, %arg0, %c0_i32 : i32
    %1 = arith.extui %0 : i1 to i32
    %c0_i32_0 = arith.constant 0 : i32
    %2 = arith.cmpi ne, %1, %c0_i32_0 : i32
    scf.if %2 {
      %c0_41 = arith.constant 0 : index
      %c0_42 = arith.constant 0 : index
      %61 = vector.load %arg1[%c0_41, %c0_42] : memref<32x128xbf16, #tpu.memory_space<vmem>>, vector<32x128xbf16>
      %c0_43 = arith.constant 0 : index
      %c0_44 = arith.constant 0 : index
      %62 = vector.load %arg12[%c0_43, %c0_44] : memref<32x128xbf16, #tpu.memory_space<vmem>>, vector<32x128xbf16>
      tpu.vector_store %arg12[%c0_43, %c0_44], %61 {strides = array<i32>} : memref<32x128xbf16, #tpu.memory_space<vmem>>, vector<32x128xbf16>,
      %cst_45 = arith.constant 0.000000e+00 : f32
      %63 = vector.broadcast %cst_45 : f32 to vector<32x1xf32>
      %c0_46 = arith.constant 0 : index
      %c0_47 = arith.constant 0 : index
      %64 = vector.load %arg13[%c0_46, %c0_47] : memref<32x1xf32, #tpu.memory_space<vmem>>, vector<32x1xf32>
      tpu.vector_store %arg13[%c0_46, %c0_47], %63 {strides = array<i32>} : memref<32x1xf32, #tpu.memory_space<vmem>>, vector<32x1xf32>,
    } else {
    }
    %c0 = arith.constant 0 : index
    %c0_1 = arith.constant 0 : index
    %3 = vector.load %arg12[%c0, %c0_1] : memref<32x128xbf16, #tpu.memory_space<vmem>>, vector<32x128xbf16>
    %c0_2 = arith.constant 0 : index
    %c0_3 = arith.constant 0 : index
    %4 = vector.load %arg2[%c0_2, %c0_3] : memref<32x32xbf16, #tpu.memory_space<vmem>>, vector<32x32xbf16>
    %c0_4 = arith.constant 0 : index
    %c0_5 = arith.constant 0 : index
    %c0_6 = arith.constant 0 : index
    %5 = vector.load %arg3[%c0_4, %c0_5, %c0_6] : memref<1x128x128xbf16, #tpu.memory_space<vmem>>, vector<1x128x128xbf16>
    %6 = vector.shape_cast %5 : vector<1x128x128xbf16> to vector<128x128xbf16>
    %c0_7 = arith.constant 0 : index
    %c0_8 = arith.constant 0 : index
    %c0_9 = arith.constant 0 : index
    %7 = vector.load %arg4[%c0_7, %c0_8, %c0_9] : memref<1x1x128xbf16, #tpu.memory_space<vmem>>, vector<1x1x128xbf16>
    %8 = vector.shape_cast %7 : vector<1x1x128xbf16> to vector<1x128xbf16>
    %c0_10 = arith.constant 0 : index
    %c0_11 = arith.constant 0 : index
    %c0_12 = arith.constant 0 : index
    %9 = vector.load %arg5[%c0_10, %c0_11, %c0_12] : memref<1x128x128xbf16, #tpu.memory_space<vmem>>, vector<1x128x128xbf16>
    %10 = vector.shape_cast %9 : vector<1x128x128xbf16> to vector<128x128xbf16>
    %c0_13 = arith.constant 0 : index
    %c0_14 = arith.constant 0 : index
    %c0_15 = arith.constant 0 : index
    %11 = vector.load %arg6[%c0_13, %c0_14, %c0_15] : memref<1x1x128xbf16, #tpu.memory_space<vmem>>, vector<1x1x128xbf16>
    %12 = vector.shape_cast %11 : vector<1x1x128xbf16> to vector<1x128xbf16>
    %c0_16 = arith.constant 0 : index
    %c0_17 = arith.constant 0 : index
    %c0_18 = arith.constant 0 : index
    %13 = vector.load %arg7[%c0_16, %c0_17, %c0_18] : memref<1x128x128xbf16, #tpu.memory_space<vmem>>, vector<1x128x128xbf16>
    %14 = vector.shape_cast %13 : vector<1x128x128xbf16> to vector<128x128xbf16>
    %c0_19 = arith.constant 0 : index
    %c0_20 = arith.constant 0 : index
    %c0_21 = arith.constant 0 : index
    %15 = vector.load %arg8[%c0_19, %c0_20, %c0_21] : memref<1x1x128xbf16, #tpu.memory_space<vmem>>, vector<1x1x128xbf16>
    %16 = vector.shape_cast %15 : vector<1x1x128xbf16> to vector<1x128xbf16>
    %c0_22 = arith.constant 0 : index
    %c0_23 = arith.constant 0 : index
    %c0_24 = arith.constant 0 : index
    %17 = vector.load %arg9[%c0_22, %c0_23, %c0_24] : memref<1x1x128xbf16, #tpu.memory_space<vmem>>, vector<1x1x128xbf16>
    %18 = vector.shape_cast %17 : vector<1x1x128xbf16> to vector<1x128xbf16>
    %c0_25 = arith.constant 0 : index
    %c0_26 = arith.constant 0 : index
    %c0_27 = arith.constant 0 : index
    %19 = vector.load %arg10[%c0_25, %c0_26, %c0_27] : memref<1x1x1xbf16, #tpu.memory_space<vmem>>, vector<1x1x1xbf16>
    %20 = vector.shape_cast %19 : vector<1x1x1xbf16> to vector<1x1xbf16>
    %cst = arith.constant dense<0.000000e+00> : vector<32x128xf32>
    %21 = tpu.matmul %4, %3, %cst {dimension_numbers = #tpu.dot_dimension_numbers<[1], [0], [0], [1], [0, 0, 1, 1], [], []>} : vector<32x32xbf16>, vector<32x128xbf16>, vector<32x128xf32> -> vector<32x128xf32>
    %22 = arith.truncf %21 : vector<32x128xf32> to vector<32x128xbf16>
    %cst_28 = arith.constant dense<0.000000e+00> : vector<32x128xf32>
    %23 = tpu.matmul %22, %6, %cst_28 {dimension_numbers = #tpu.dot_dimension_numbers<[1], [0], [0], [1], [0, 0, 1, 1], [], []>} : vector<32x128xbf16>, vector<128x128xbf16>, vector<32x128xf32> -> vector<32x128xf32>
    %24 = arith.extf %8 : vector<1x128xbf16> to vector<1x128xf32>
    %25 = vector.broadcast %24 : vector<1x128xf32> to vector<32x128xf32>
    %26 = arith.addf %23, %25 : vector<32x128xf32>
    %cst_29 = arith.constant 0.000000e+00 : f32
    %27 = vector.broadcast %cst_29 : f32 to vector<32x128xf32>
    %28 = arith.cmpf ogt, %26, %27 : vector<32x128xf32>
    %cst_30 = arith.constant 0.00999999977 : f32
    %29 = vector.broadcast %cst_30 : f32 to vector<32x128xf32>
    %30 = arith.mulf %29, %26 : vector<32x128xf32>
    %31 = arith.select %28, %26, %30 : vector<32x128xi1>, vector<32x128xf32>
    %32 = arith.truncf %31 : vector<32x128xf32> to vector<32x128xbf16>
    %cst_31 = arith.constant dense<0.000000e+00> : vector<32x128xf32>
    %33 = tpu.matmul %32, %10, %cst_31 {dimension_numbers = #tpu.dot_dimension_numbers<[1], [0], [0], [1], [0, 0, 1, 1], [], []>} : vector<32x128xbf16>, vector<128x128xbf16>, vector<32x128xf32> -> vector<32x128xf32>
    %34 = arith.extf %12 : vector<1x128xbf16> to vector<1x128xf32>
    %35 = vector.broadcast %34 : vector<1x128xf32> to vector<32x128xf32>
    %36 = arith.addf %33, %35 : vector<32x128xf32>
    %37 = math.tanh %36 : vector<32x128xf32>
    %38 = arith.truncf %37 : vector<32x128xf32> to vector<32x128xbf16>
    %cst_32 = arith.constant dense<0.000000e+00> : vector<32x128xf32>
    %39 = tpu.matmul %38, %14, %cst_32 {dimension_numbers = #tpu.dot_dimension_numbers<[1], [0], [0], [1], [0, 0, 1, 1], [], []>} : vector<32x128xbf16>, vector<128x128xbf16>, vector<32x128xf32> -> vector<32x128xf32>
    %40 = arith.extf %16 : vector<1x128xbf16> to vector<1x128xf32>
    %41 = vector.broadcast %40 : vector<1x128xf32> to vector<32x128xf32>
    %42 = arith.addf %39, %41 : vector<32x128xf32>
    %43 = math.tanh %42 : vector<32x128xf32>
    %44 = arith.extf %18 : vector<1x128xbf16> to vector<1x128xf32>
    %45 = vector.broadcast %44 : vector<1x128xf32> to vector<32x128xf32>
    %46 = arith.mulf %43, %45 : vector<32x128xf32>
    %cst_33 = arith.constant dense<0.000000e+00> : vector<32xf32>
    %47 = vector.multi_reduction <add>, %46, %cst_33 [1] : vector<32x128xf32> to vector<32xf32>
    %48 = vector.shape_cast %47 : vector<32xf32> to vector<32x1xf32>
    %49 = arith.extf %20 : vector<1x1xbf16> to vector<1x1xf32>
    %50 = vector.broadcast %49 : vector<1x1xf32> to vector<32x1xf32>
    %51 = arith.addf %48, %50 : vector<32x1xf32>
    %52 = math.absf %51 : vector<32x1xf32>
    %53 = arith.truncf %31 : vector<32x128xf32> to vector<32x128xbf16>
    %c0_34 = arith.constant 0 : index
    %c0_35 = arith.constant 0 : index
    %54 = vector.load %arg12[%c0_34, %c0_35] : memref<32x128xbf16, #tpu.memory_space<vmem>>, vector<32x128xbf16>
    tpu.vector_store %arg12[%c0_34, %c0_35], %53 {strides = array<i32>} : memref<32x128xbf16, #tpu.memory_space<vmem>>, vector<32x128xbf16>,
    %c0_36 = arith.constant 0 : index
    %c0_37 = arith.constant 0 : index
    %55 = vector.load %arg13[%c0_36, %c0_37] : memref<32x1xf32, #tpu.memory_space<vmem>>, vector<32x1xf32>
    %56 = arith.addf %55, %52 : vector<32x1xf32>
    %c0_38 = arith.constant 0 : index
    %c0_39 = arith.constant 0 : index
    %57 = vector.load %arg13[%c0_38, %c0_39] : memref<32x1xf32, #tpu.memory_space<vmem>>, vector<32x1xf32>
    tpu.vector_store %arg13[%c0_38, %c0_39], %56 {strides = array<i32>} : memref<32x1xf32, #tpu.memory_space<vmem>>, vector<32x1xf32>,
    %c4_i32 = arith.constant 4 : i32
    %58 = arith.cmpi eq, %arg0, %c4_i32 : i32
    %59 = arith.extui %58 : i1 to i32
    %c0_i32_40 = arith.constant 0 : i32
    %60 = arith.cmpi ne, %59, %c0_i32_40 : i32
    scf.if %60 {
      %c0_41 = arith.constant 0 : index
      %c0_42 = arith.constant 0 : index
      %61 = vector.load %arg13[%c0_41, %c0_42] : memref<32x1xf32, #tpu.memory_space<vmem>>, vector<32x1xf32>
      %62 = vector.extract_strided_slice %61 {offsets = [0, 0], sizes = [16, 1], strides = [1, 1]} : vector<32x1xf32> to vector<16x1xf32>
      %63 = vector.extract_strided_slice %61 {offsets = [16, 0], sizes = [16, 1], strides = [1, 1]} : vector<32x1xf32> to vector<16x1xf32>
      %64 = arith.mulf %62, %63 : vector<16x1xf32>
      %c0_43 = arith.constant 0 : index
      %c0_44 = arith.constant 0 : index
      %65 = vector.load %arg11[%c0_43, %c0_44] : memref<16x1xf32, #tpu.memory_space<vmem>>, vector<16x1xf32>
      tpu.vector_store %arg11[%c0_43, %c0_44], %64 {strides = array<i32>} : memref<16x1xf32, #tpu.memory_space<vmem>>, vector<16x1xf32>,
    } else {
    }
    return
  }
  func.func @transform_0(%arg0: i32) -> (i32, i32) {
    %c0_i32 = arith.constant 0 : i32
    %c0_i32_0 = arith.constant 0 : i32
    %c0_i32_1 = arith.constant 0 : i32
    return %c0_i32, %c0_i32_0 : i32, i32
  }
  func.func @transform_1(%arg0: i32) -> (i32, i32) {
    %c0_i32 = arith.constant 0 : i32
    %c0_i32_0 = arith.constant 0 : i32
    %c0_i32_1 = arith.constant 0 : i32
    return %c0_i32, %c0_i32_0 : i32, i32
  }
  func.func @transform_2(%arg0: i32) -> (i32, i32, i32) {
    %c0_i32 = arith.constant 0 : i32
    %c0_i32_0 = arith.constant 0 : i32
    %c0_i32_1 = arith.constant 0 : i32
    return %arg0, %c0_i32, %c0_i32_0 : i32, i32, i32
  }
  func.func @transform_3(%arg0: i32) -> (i32, i32, i32) {
    %c0_i32 = arith.constant 0 : i32
    %c0_i32_0 = arith.constant 0 : i32
    %c0_i32_1 = arith.constant 0 : i32
    return %arg0, %c0_i32, %c0_i32_0 : i32, i32, i32
  }
  func.func @transform_4(%arg0: i32) -> (i32, i32, i32) {
    %c0_i32 = arith.constant 0 : i32
    %c0_i32_0 = arith.constant 0 : i32
    %c0_i32_1 = arith.constant 0 : i32
    return %arg0, %c0_i32, %c0_i32_0 : i32, i32, i32
  }
  func.func @transform_5(%arg0: i32) -> (i32, i32, i32) {
    %c0_i32 = arith.constant 0 : i32
    %c0_i32_0 = arith.constant 0 : i32
    %c0_i32_1 = arith.constant 0 : i32
    return %arg0, %c0_i32, %c0_i32_0 : i32, i32, i32
  }
  func.func @transform_6(%arg0: i32) -> (i32, i32, i32) {
    %c0_i32 = arith.constant 0 : i32
    %c0_i32_0 = arith.constant 0 : i32
    %c0_i32_1 = arith.constant 0 : i32
    return %arg0, %c0_i32, %c0_i32_0 : i32, i32, i32
  }
  func.func @transform_7(%arg0: i32) -> (i32, i32, i32) {
    %c0_i32 = arith.constant 0 : i32
    %c0_i32_0 = arith.constant 0 : i32
    %c0_i32_1 = arith.constant 0 : i32
    return %arg0, %c0_i32, %c0_i32_0 : i32, i32, i32
  }
  func.func @transform_8(%arg0: i32) -> (i32, i32, i32) {
    %c0_i32 = arith.constant 0 : i32
    %c0_i32_0 = arith.constant 0 : i32
    %c0_i32_1 = arith.constant 0 : i32
    return %arg0, %c0_i32, %c0_i32_0 : i32, i32, i32
  }
  func.func @transform_9(%arg0: i32) -> (i32, i32, i32) {
    %c0_i32 = arith.constant 0 : i32
    %c0_i32_0 = arith.constant 0 : i32
    %c0_i32_1 = arith.constant 0 : i32
    return %arg0, %c0_i32, %c0_i32_0 : i32, i32, i32
  }
  func.func @transform_10(%arg0: i32) -> (i32, i32) {
    %c0_i32 = arith.constant 0 : i32
    %c0_i32_0 = arith.constant 0 : i32
    %c0_i32_1 = arith.constant 0 : i32
    return %c0_i32, %c0_i32_0 : i32, i32
  }
}

</mosaic_0001>

<bundles_post_ra>
// kernel: tpu_custom_call.1
= control target key start
LH: loop header
LB: loop body
LE: loop exit
PB: predicated region body
PF: predicated region fallthrough
CT: control target
= control target key end

     0   :  { %s1937_s0 = inlined_call_operand.vmem [shape: bf16[32,128], index: 0, kind: input, shape index: {}]   ;;  %s1938_s1 = inlined_call_operand.vmem [shape: bf16[32,32], index: 1, kind: input, shape index: {}]   ;;  %s1939_s2 = inlined_call_operand.hbm [shape: bf16[5,128,128], index: 2, kind: input, shape index: {}]   ;;  %s1940_s3 = inlined_call_operand.vmem [shape: bf16[5,1,128], index: 3, kind: input, shape index: {}]   ;;  %s1941_s4 = inlined_call_operand.hbm [shape: bf16[5,128,128], index: 4, kind: input, shape index: {}]   ;;  %s1942_s5 = inlined_call_operand.vmem [shape: bf16[5,1,128], index: 5, kind: input, shape index: {}]   ;;  %s1943_s6 = inlined_call_operand.hbm [shape: bf16[5,128,128], index: 6, kind: input, shape index: {}]   ;;  %s1944_s7 = inlined_call_operand.vmem [shape: bf16[5,1,128], index: 7, kind: input, shape index: {}]   ;;  %s1945_s8 = inlined_call_operand.vmem [shape: bf16[5,1,128], index: 8, kind: input, shape index: {}]   ;;  %s1946_s9 = inlined_call_operand.vmem [shape: bf16[5,1,1], index: 9, kind: input, shape index: {}]   ;;  %s1947_s10 = inlined_call_operand.vmem [shape: f32[16,1], index: 10, kind: output, shape index: {}]  }
   0x1   :  { %1958 = sst [smem:[#allocation13_spill]] %s1938_s1 }
   0x2   :  { %1959 = sst [smem:[#allocation14_spill]] %s1941_s4 }
   0x3   :  { %1960 = sst [smem:[#allocation15_spill]] %s1947_s10 }
   0x4   :  { %15 = vsyncpa [#allocation5], 0 }
   0x5   :  { %17 = vsyncpa [#allocation5 + $0x1], 0 }
   0x6   :  { %18 = vsyncpa [#allocation7], 0 }
   0x7   :  { %20 = vsyncpa [#allocation7 + $0x1], 0  ;;  %s1623_s13 = smov 0   ;;  %s1625_s14 = smov 0  }
   0x8   :  { %s1627_s15 = smov 0   ;;  %s1629_s16 = smov 0  }
   0x9 LB: > { %s1642_s17 = sadd.s32 4294967295, %s1560_s16   ;;  %s1645_s18 = sadd.s32 1, %s1560_s16   ;;  %s1560_s16 = sphi %s1629_s16, %s1977_s16   ;;  %s1556_s15 = sphi %s1627_s15, %s1981_s15   ;;  %s1552_s14 = sphi %s1625_s14, %s1980_s14   ;;  %s1548_s13 = sphi %s1623_s13, %s1979_s13  }
   0xa   : > { %1961 = sst [smem:[#allocation11_spill]] %s1645_s18  ;;  %s72_s19 = ssub.s32 %s1560_s16, %s1645_s18 }
   0xb   : > { %s75_s20 = sadd.s32 1, %s1556_s15  ;;  %p73_p0 = scmp.eq.s32.totalorder %s72_s19, 0 }
   0xc   : > { %p82_p1 = scmp.ne.s32.totalorder %s1556_s15, %s1552_s14  ;;  %p83_p2 = scmp.eq.s32.totalorder %s1560_s16, 0 }
   0xd   : > { %p88_p3 = scmp.ne.s32.totalorder %s1552_s14, %s1548_s13  ;;  %p89_p5 = scmp.eq.s32.totalorder %s1642_s17, 0 }
   0xe   : > { %s1655_s21 = scalar_select %p73_p0, %s1556_s15, %s75_s20  }
   0xf   : > { %p84_p4 = por %p83_p2, %p82_p1  ;;  %p1352_p6 = scmp.lt.s32.totalorder %s1560_s16, 5 }
  0x10   : > { %1962 = sst [smem:[#allocation12_spill]] %s1655_s21  ;;  %p1659_p7 = por %p89_p5, %p88_p3 }
  0x11   : > { %s1948_s23 = sand.u32 1, %s1556_s15   ;;  %s1669_s25 = sshll.u32 %s1560_s16, 10 }
  0x12   : > { %s1963_s22 = scalar_select %p1659_p7, 1, 0 }
  0x13   : > { %s1666_s24 = sshll.u32 %s1948_s23, 6  ;;  %p1671_p8 = pnand %p1352_p6, %p84_p4 }
  0x14   : > { %s348_s27 = sand.u32 1, %s1560_s16   ;;  %s1965_s4 = sld [smem:[#allocation14_spill]] }
  0x15   : > { %s352_s11 = scalar_lea.vmem [#allocation6], %s1666_s24  ;;  %s1687_s13 = scalar_lea.sflag [#allocation7], %s348_s27 }
  0x16   : > { %s359_s12 = sshll.u32 %s352_s11, 4  ;;  %p1693_p12 = pneg %p1671_p8  ;;  %s1684_s12 = int_to_ptr.vmem [resolvable:$true] %s359_s12 }
  0x1a   : > { %s1680_s30 = scalar_lea.hbm %s1965_s4, %s1669_s25  ;;  %s1437_s11 = scalar_lea.hbm %s1965_s4, 5120 }
  0x1b   : > { %s1432_s19 = scalar_lea.hbm %s1680_s30, 1024  ;;  %p1438_p1 = scmp.lt.u32.totalorder %s1680_s30, %s1965_s4 }
  0x1c   : > { %p1433_p11 = scmp.ne.s32.totalorder %s1680_s30, %s1432_s19  ;;  %p1439_p2 = scmp.lt.u32.totalorder %s1437_s11, %s1432_s19 }
  0x1d   : > { %p1441_p4 = scmp.lt.u32.totalorder %s1432_s19, %s1680_s30 }
  0x1e   : > { %p1435_p13 = pnand %p1693_p12, %p1433_p11  ;;  %p1440_p3 = por %p1439_p2, %p1438_p1 }
  0x20   : > { %p1436_p0 = pneg %p1435_p13  ;;  %p1442_p5 = por %p1441_p4, %p1440_p3 }
  0x22   : > { %p1443_p6 = pnand %p1442_p5, %p1436_p0 }
  0x24   : > { %1446 = shalt.err (!%p1443_p6)
}
  0x25   : > { %s1447_s27 = scalar_lea.vmem %s1684_s12, 1024  ;;  %s1562_s28 = smov [#allocation6]  }
  0x26   : > { %p1448_p11 = scmp.ne.s32.totalorder %s1684_s12, %s1447_s27  ;;  %s1452_s29 = sshll.u32 %s1562_s28, 4  ;;  %s1453_s29 = int_to_ptr.vmem [resolvable:$false] %s1452_s29 }
  0x27   : > { %s1454_s21 = scalar_lea.vmem %s1453_s29, 2048  ;;  %p1455_p10 = scmp.lt.s32.totalorder %s1684_s12, %s1453_s29 }
  0x28   : > { %p1450_p13 = pnand %p1448_p11, %p1693_p12  ;;  %p1456_p7 = scmp.lt.s32.totalorder %s1454_s21, %s1447_s27 }
  0x2a   : > { %p1451_p9 = pneg %p1450_p13  ;;  %p1457_p1 = por %p1456_p7, %p1455_p10 }
  0x2c   : > { %p1458_p2 = pnand %p1457_p1, %p1451_p9 }
  0x2e   : > { %1461 = shalt.err (!%p1458_p2)
}
  0x2f   : > { %s1950_s23 = smov 64   ;;  %s1952_s19 = smov 4  }
  0x30   : > { %1348 = dma.hbm_to_vmem [thread:$0]  (!%p1671_p8), %s1680_s30, 1024, %s1684_s12, %s1687_s13, %s1950_s23, %s1950_s23, %s1952_s19  }
  0x31   : > { %p1967_p7 = scmp.lt.s32.totalorder %s1560_s16, 6  ;;  %p1968_p9 = scmp.ge.s32.totalorder %s1560_s16, 1 }
  0x32   : > { %s1732_s29 = scalar_lea.hbm %s1939_s2, %s1669_s25  ;;  %s325_s21 = scalar_lea.vmem [#allocation4], %s1666_s24 }
  0x33   : > { %p1724_p10 = pnand %p1968_p9, %p1967_p7  ;;  %s332_s4 = sshll.u32 %s325_s21, 4  ;;  %s1735_s4 = int_to_ptr.vmem [resolvable:$true] %s332_s4 }
  0x34   : > { %s1741_s16 = scalar_lea.hbm %s1943_s6, %s1669_s25  ;;  %s1970_s23 = sand.u32 1, %s1556_s15  }
  0x35   : > { %s1969_s11 = scalar_select %p1724_p10, 1, 0 }
  0x36   : > { %s1745_s19 = scalar_lea.sflag [#allocation5], %s1970_s23  ;;  %s1462_s18 = scalar_lea.hbm %s1732_s29, 1024 }
  0x37   : > { %p1463_p0 = scmp.ne.s32.totalorder %s1732_s29, %s1462_s18  ;;  %s1467_s10 = scalar_lea.hbm %s1939_s2, 5120 }
  0x38   : > { %p1468_p5 = scmp.lt.u32.totalorder %s1732_s29, %s1939_s2  ;;  %p1469_p6 = scmp.lt.u32.totalorder %s1467_s10, %s1462_s18 }
  0x39   : > { %p1465_p3 = pnand %p1463_p0, %p1693_p12  ;;  %p1471_p13 = scmp.lt.u32.totalorder %s1462_s18, %s1732_s29 }
  0x3a   : > { %p1470_p11 = por %p1469_p6, %p1468_p5 }
  0x3b   : > { %p1466_p4 = pneg %p1465_p3 }
  0x3c   : > { %p1472_p1 = por %p1471_p13, %p1470_p11 }
  0x3e   : > { %p1473_p2 = pnand %p1472_p1, %p1466_p4 }
  0x40   : > { %1476 = shalt.err (!%p1473_p2)
}
  0x41   : > { %s1477_s25 = scalar_lea.vmem %s1735_s4, 1024  ;;  %s1565_s23 = smov [#allocation4]  }
  0x42   : > { %p1478_p7 = scmp.ne.s32.totalorder %s1735_s4, %s1477_s25  ;;  %s1482_s30 = sshll.u32 %s1565_s23, 4  ;;  %s1483_s30 = int_to_ptr.vmem [resolvable:$false] %s1482_s30 }
  0x43   : > { %s1484_s1 = scalar_lea.vmem %s1483_s30, 2048  ;;  %p1485_p3 = scmp.lt.s32.totalorder %s1735_s4, %s1483_s30 }
  0x44   : > { %p1480_p9 = pnand %p1478_p7, %p1693_p12  ;;  %p1486_p10 = scmp.lt.s32.totalorder %s1484_s1, %s1477_s25 }
  0x46   : > { %p1481_p0 = pneg %p1480_p9  ;;  %p1487_p5 = por %p1486_p10, %p1485_p3 }
  0x48   : > { %p1488_p6 = pnand %p1487_p5, %p1481_p0 }
  0x4a   : > { %1491 = shalt.err (!%p1488_p6)
}
  0x4b   : > { %s1971_s10 = smov 4   ;;  %s1972_s18 = smov 64  }
  0x4c   : > { %1345 = dma.hbm_to_vmem [thread:$0]  (!%p1671_p8), %s1732_s29, 1024, %s1735_s4, %s1745_s19, %s1972_s18, %s1972_s18, %s1971_s10  }
  0x4d   : > { %s379_s12 = scalar_lea.vmem [#allocation8], %s1666_s24  ;;  %s1492_s28 = scalar_lea.hbm %s1741_s16, 1024 }
  0x4e   : > { %s386_s27 = sshll.u32 %s379_s12, 4  ;;  %p1493_p10 = scmp.ne.s32.totalorder %s1741_s16, %s1492_s28  ;;  %s1773_s27 = int_to_ptr.vmem [resolvable:$true] %s386_s27 }
  0x4f   : > { %s1497_s23 = scalar_lea.hbm %s1943_s6, 5120  ;;  %p1498_p13 = scmp.lt.u32.totalorder %s1741_s16, %s1943_s6 }
  0x50   : > { %p1495_p4 = pnand %p1493_p10, %p1693_p12  ;;  %p1499_p1 = scmp.lt.u32.totalorder %s1497_s23, %s1492_s28 }
  0x51   : > { %p1501_p7 = scmp.lt.u32.totalorder %s1492_s28, %s1741_s16 }
  0x52   : > { %p1496_p11 = pneg %p1495_p4  ;;  %p1500_p2 = por %p1499_p1, %p1498_p13 }
  0x54   : > { %p1502_p9 = por %p1501_p7, %p1500_p2 }
  0x56   : > { %p1503_p0 = pnand %p1502_p9, %p1496_p11 }
  0x58   : > { %1506 = shalt.err (!%p1503_p0)
}
  0x59   : > { %s1507_s4 = scalar_lea.vmem %s1773_s27, 1024  ;;  %s1566_s24 = smov [#allocation8]  }
  0x5a   : > { %p1508_p3 = scmp.ne.s32.totalorder %s1773_s27, %s1507_s4  ;;  %s1512_s19 = sshll.u32 %s1566_s24, 4  ;;  %s1513_s19 = int_to_ptr.vmem [resolvable:$false] %s1512_s19 }
  0x5b   : > { %s1514_s29 = scalar_lea.vmem %s1513_s19, 2048  ;;  %p1515_p10 = scmp.lt.s32.totalorder %s1773_s27, %s1513_s19 }
  0x5c   : > { %p1510_p5 = pnand %p1508_p3, %p1693_p12  ;;  %p1516_p4 = scmp.lt.s32.totalorder %s1514_s29, %s1507_s4 }
  0x5e   : > { %p1511_p6 = pneg %p1510_p5  ;;  %p1517_p13 = por %p1516_p4, %p1515_p10 }
  0x60   : > { %p1518_p1 = pnand %p1517_p13, %p1511_p6 }
  0x62   : > { %1521 = shalt.err (!%p1518_p1)
}
  0x63   : > { %1351 = dma.hbm_to_vmem [thread:$0]  (!%p1671_p8), %s1741_s16, 1024, %s1773_s27, %s1687_s13, %s1972_s18, %s1972_s18, %s1971_s10  }
  0x64   : > { %p1973_p12 = scmp.ne.s32.totalorder %s1969_s11, 0 }
  0x65   : > { %s418_s20 = sand.u32 (!%p1973_p12), 1, %s1552_s14   ;;  %p1974_p11 = scmp.ne.s32.totalorder (!%p1973_p12), %s1963_s22, 0 }
  0x66   : > { %416 = sbr.rel (%p1973_p12) target bundleno = 1196 (0x4ac), region = 60  ;;  %s1194_s12 = sshll.u32 (!%p1973_p12), %s418_s20, 6 }
  0x67   : > { %s419_s28 = scalar_lea.sflag (!%p1973_p12), [#allocation5], %s418_s20  ;;  %s1803_s21 = scalar_lea.vmem (!%p1973_p12), [#allocation4], %s1194_s12 }
  0x6d   : > { %1539 = dma.done.wait (%p1974_p11), %s419_s28, 1024  }
  0x6e   : > { %1541 = vsyncadd (%p1974_p11), %s419_s28, 4294966272  ;;  %s427_s26 = sand.u32 1, %s1642_s17   ;;  %s1810_s13 = scalar_lea.vmem [#allocation6], %s1194_s12 }
  0x6f   : > { %s428_s25 = scalar_lea.sflag [#allocation7], %s427_s26 }
  0x70   : > { %1543 = dma.done.wait (%p1974_p11), %s428_s25, 2048  }
  0x71   : > { %1545 = vsyncadd (%p1974_p11), %s428_s25, 4294965248  ;;  %p497_p8 = scmp.lt.s32.totalorder %s1642_s17, 4  ;;  %s1840_s25 = scalar_lea.vmem [#allocation8], %s1194_s12 }
  0x72   : > { %p1197_p2 = scmp.ne.s32.totalorder %s1642_s17, 0 }
  0x73   : > { %s1818_s11 = scalar_select %p497_p8, %s1642_s17, 4 }
  0x74   : > { %516 = sbr.rel (%p1197_p2) target bundleno = 123 (0x7b), region = 76  ;;  %v1388_v0 = vld [vmem:[%s1937_s0] sm:$0xff] (!%p1197_p2)   ;;  %vm535_vm0 = vcmask (!%p1197_p2), 7168   ;;  %v1389_v1 = vld [vmem:[%s1937_s0 + $0x8] sm:$0xff] (!%p1197_p2)   ;;  %v1567_v2 = vmov (!%p1197_p2), 0.0  }
  0x75   : > { %s499_s18 = scalar_lea.vmem %s1940_s3, %s1818_s11  ;;  %s502_s30 = scalar_lea.vmem %s1942_s5, %s1818_s11  ;;  %533 = vst [vmem:[#allocation2] sm:$0xff] (!%p1197_p2), %v1388_v0  ;;  %536 = vst.msk [vmem:[#allocation3] sm:$0xff] (!%p1197_p2), %vm535_vm0, %v1567_v2 }
  0x76   : > { %s505_s4 = scalar_lea.vmem %s1944_s7, %s1818_s11  ;;  %s508_s29 = scalar_lea.vmem %s1945_s8, %s1818_s11  ;;  %537 = vst.msk [vmem:[#allocation3 + $0x8] sm:$0xff] (!%p1197_p2), %vm535_vm0, %v1567_v2  ;;  %538 = vst.msk [vmem:[#allocation3 + $0x10] sm:$0xff] (!%p1197_p2), %vm535_vm0, %v1567_v2 }
  0x77   : > { %s511_s26 = scalar_lea.vmem %s1946_s9, %s1818_s11  ;;  %539 = vst.msk [vmem:[#allocation3 + $0x18] sm:$0xff] (!%p1197_p2), %vm535_vm0, %v1567_v2  ;;  %534 = vst [vmem:[#allocation2 + $0x8] sm:$0xff] (!%p1197_p2), %v1389_v1 }
  0x7b PF: > { %vm609_vm1 = vcmask 261120   ;;  %s1975_s1 = sld [smem:[#allocation13_spill]]  ;;  %v1392_v6 = vld [vmem:[%s1803_s21] sm:$0xff]   ;;  %v1393_v7 = vld [vmem:[%s1803_s21 + $0x8] sm:$0xff]   ;;  %v1394_v9 = vld [vmem:[%s1803_s21 + $0x10] sm:$0xff]   ;;  %v668_v32 = vlaneseq  ;;  %vm1037_vm6 = vcmask 7168  }
  0x7c   : > { %v540_v3 = vld [vmem:[#allocation2] sm:$0xff]  ;;  %1276 = vmatprep.subr.bf16.mxu1 %v1392_v6  ;;  %v1395_v10 = vld [vmem:[%s1803_s21 + $0x18] sm:$0xff]   ;;  %v1396_v11 = vld [vmem:[%s1803_s21 + $0x20] sm:$0xff]   ;;  %p1228_p7 = scmp.ne.s32.totalorder %s1642_s17, 4 }
  0x7d   : > { %1268 = vmatprep.subr.bf16.mxu0 %v540_v3  ;;  %1277 = vmatpush3.bf16.msra.mxu1 %v1392_v6  ;;  %v1397_v12 = vld [vmem:[%s1803_s21 + $0x28] sm:$0xff]   ;;  %v1398_v13 = vld [vmem:[%s1803_s21 + $0x30] sm:$0xff]   ;;  %v1399_v14 = vld [vmem:[%s1803_s21 + $0x38] sm:$0xff]   ;;  %v669_v33 = vshrl.u32 %v668_v32, 7  ;;  %s1976_s10 = sld [smem:[#allocation15_spill]] (!%p1228_p7) }
  0x7e   : > { %v541_v4 = vld [vmem:[#allocation2 + $0x8] sm:$0xff]  ;;  %1269 = vmatpush3.bf16.msra.mxu0 %v540_v3  ;;  %1278 = vmatprep.subr.bf16.mxu1 %v1393_v7  ;;  %v1400_v15 = vld [vmem:[%s1810_s13] sm:$0xff]   ;;  %v1401_v16 = vld [vmem:[%s1810_s13 + $0x8] sm:$0xff]  }
  0x7f   : > { %1270 = vmatprep.subr.bf16.mxu0 %v541_v4  ;;  %v1402_v17 = vld [vmem:[%s1810_s13 + $0x10] sm:$0xff]   ;;  %v1403_v18 = vld [vmem:[%s1810_s13 + $0x18] sm:$0xff]   ;;  %v1404_v19 = vld [vmem:[%s1810_s13 + $0x20] sm:$0xff]   ;;  %v1879_v36 = vsub.s32 0, %v669_v33 }
  0x80   : > { %v1405_v26 = vld [vmem:[%s1810_s13 + $0x28] sm:$0xff]   ;;  %v1406_v27 = vld [vmem:[%s1810_s13 + $0x30] sm:$0xff]   ;;  %v1407_v28 = vld [vmem:[%s1810_s13 + $0x38] sm:$0xff]  }
  0x81   : > { %v1390_v5 = vld [vmem:[%s1975_s1] sm:$0xff]   ;;  %v1391_v8 = vld [vmem:[%s1975_s1 + $0x8] sm:$0xff]   ;;  %1279 = vmatpush3.bf16.msra.mxu1 %v1393_v7  ;;  %v1408_v29 = vld [vmem:[%s1840_s25] sm:$0xff]  }
  0x82   : > { %1272 = vmatprep.mubr.msk.bf16.mxu0 %vm609_vm1, %v1390_v5  ;;  %1271 = vmatpush3.bf16.msra.mxu0 %v541_v4  ;;  %v1409_v30 = vld [vmem:[%s1840_s25 + $0x8] sm:$0xff]   ;;  %v1410_v31 = vld [vmem:[%s1840_s25 + $0x10] sm:$0xff]   ;;  %v1411_v56 = vld [vmem:[%s1840_s25 + $0x18] sm:$0xff]  }
  0x83   : > { %1280 = vmatprep.subr.bf16.mxu1 %v1394_v9  ;;  %1296 = vmatprep.subr.bf16.mxu0 %v1400_v15  ;;  %v562_v34 = vld [vmem:[%s499_s18] sm:$0x1]  ;;  %v1412_v57 = vld [vmem:[%s1840_s25 + $0x20] sm:$0xff]   ;;  %v1413_v58 = vld [vmem:[%s1840_s25 + $0x28] sm:$0xff]  }
  0x84   : > { %v667_v35 = vunpack.c.l.bf16 %v562_v34  ;;  %v1414_v59 = vld [vmem:[%s1840_s25 + $0x30] sm:$0xff]   ;;  %v1415_v60 = vld [vmem:[%s1840_s25 + $0x38] sm:$0xff]  }
  0x85   : > { %1273 = vmatmul.mubr.msk.bf16.vlgmr.msra.gmra.mrb[0].mxu0 %vm609_vm1, %v1391_v8  ;;  %1281 = vmatpush3.bf16.msra.mxu1 %v1394_v9  ;;  %v579_v61 = vld [vmem:[%s502_s30] sm:$0x1] }
  0x86   : > { %1282 = vmatprep.subr.bf16.mxu1 %v1395_v10  ;;  %1297 = vmatpush3.bf16.msra.mxu0 %v1400_v15  ;;  %v671_v37 = vrot.slane %v667_v35, %v1879_v36  ;;  %v783_v62 = vunpack.c.l.bf16 %v579_v61 }
  0x87   : > { %1298 = vmatprep.subr.bf16.mxu0 %v1401_v16 }
  0x88   : > { %v787_v63 = vrot.slane %v783_v62, %v1879_v36 }
  0x89   : > { %1283 = vmatpush3.bf16.msra.mxu1 %v1395_v10 }
  0x8a   : > { %1284 = vmatprep.subr.bf16.mxu1 %v1396_v11  ;;  %1299 = vmatpush3.bf16.msra.mxu0 %v1401_v16 }
  0x8b   : > { %1300 = vmatprep.subr.bf16.mxu0 %v1402_v17 }
  0x8d   : > { %1285 = vmatpush3.bf16.msra.mxu1 %v1396_v11 }
  0x8e   : > { %1286 = vmatprep.subr.bf16.mxu1 %v1397_v12  ;;  %1301 = vmatpush3.bf16.msra.mxu0 %v1402_v17 }
  0x8f   : > { %1302 = vmatprep.subr.bf16.mxu0 %v1403_v18 }
  0x91   : > { %1287 = vmatpush3.bf16.msra.mxu1 %v1397_v12 }
  0x92   : > { %1288 = vmatprep.subr.bf16.mxu1 %v1398_v13  ;;  %1303 = vmatpush3.bf16.msra.mxu0 %v1403_v18 }
  0x93   : > { %1304 = vmatprep.subr.bf16.mxu0 %v1404_v19 }
  0x95   : > { %1289 = vmatpush3.bf16.msra.mxu1 %v1398_v13 }
  0x96   : > { %1290 = vmatprep.subr.bf16.mxu1 %v1399_v14  ;;  %1305 = vmatpush3.bf16.msra.mxu0 %v1404_v19 }
  0x97   : > { %1306 = vmatprep.subr.bf16.mxu0 %v1405_v26 }
  0x99   : > { %1291 = vmatpush3.bf16.msra.mxu1 %v1399_v14  ;;  %v596_v14 = vld [vmem:[%s505_s4] sm:$0x1] }
  0x9a   : > { %1307 = vmatpush3.bf16.msra.mxu0 %v1405_v26  ;;  %1316 = vmatprep.subr.bf16.mxu1 %v1408_v29  ;;  %v891_v15 = vunpack.c.l.bf16 %v596_v14 }
  0x9b   : > { %1308 = vmatprep.subr.bf16.mxu0 %v1406_v27 }
  0x9c   : > { %v895_v16 = vrot.slane %v891_v15, %v1879_v36 }
  0x9e   : > { %1309 = vmatpush3.bf16.msra.mxu0 %v1406_v27 }
  0x9f   : > { %1310 = vmatprep.subr.bf16.mxu0 %v1407_v28 }
  0xa2   : > { %1311 = vmatpush3.bf16.msra.mxu0 %v1407_v28 }
 0x158   : > { %v1274_v20 = vpop.f32.mrb[0].mxu0 }
 0x159   : > { %v650_v21 = vpop.f32.mrb[1].mxu0 }
 0x15a   : > { %v1275_v22 = vpop.f32.mrb[2].mxu0 }
 0x15b   : > { %v666_v23 = vpack.c.bf16 %v1275_v22, %v1274_v20  ;;  %v653_v24 = vpop.f32.mrb[3].mxu0 }
 0x15c   : > { %v665_v25 = vpack.c.bf16 %v653_v24, %v650_v21  ;;  %v597_v24 = vld [vmem:[%s508_s29] sm:$0x1] }
 0x15d   : > { %v997_v26 = vunpack.c.l.bf16 %v597_v24 }
 0x15e   : > { %1292 = vmatprep.mubr.bf16.mxu1 %v665_v25 }
 0x15f   : > { %1293 = vmatmul.mubr.bf16.vlgmr.msra.gmra.mrb[0].mxu1 %v666_v23  ;;  %v1001_v27 = vrot.slane %v997_v26, %v1879_v36 }
 0x160   : > { %1317 = vmatpush3.bf16.msra.mxu1 %v1408_v29 }
 0x161   : > { %1318 = vmatprep.subr.bf16.mxu1 %v1409_v30 }
 0x164   : > { %1319 = vmatpush3.bf16.msra.mxu1 %v1409_v30 }
 0x165   : > { %1320 = vmatprep.subr.bf16.mxu1 %v1410_v31 }
 0x168   : > { %1321 = vmatpush3.bf16.msra.mxu1 %v1410_v31 }
 0x169   : > { %1322 = vmatprep.subr.bf16.mxu1 %v1411_v56 }
 0x16c   : > { %1323 = vmatpush3.bf16.msra.mxu1 %v1411_v56 }
 0x16d   : > { %1324 = vmatprep.subr.bf16.mxu1 %v1412_v57 }
 0x170   : > { %1325 = vmatpush3.bf16.msra.mxu1 %v1412_v57 }
 0x171   : > { %1326 = vmatprep.subr.bf16.mxu1 %v1413_v58 }
 0x174   : > { %1327 = vmatpush3.bf16.msra.mxu1 %v1413_v58 }
 0x175   : > { %1328 = vmatprep.subr.bf16.mxu1 %v1414_v59 }
 0x178   : > { %1329 = vmatpush3.bf16.msra.mxu1 %v1414_v59 }
 0x179   : > { %1330 = vmatprep.subr.bf16.mxu1 %v1415_v60 }
 0x17c   : > { %1331 = vmatpush3.bf16.msra.mxu1 %v1415_v60 }
 0x232   : > { %v1294_v38 = vpop.f32.mrb[0].mxu1 }
 0x233   : > { %v763_v39 = vadd.f32 %v1294_v38, %v671_v37  ;;  %v754_v40 = vpop.f32.mrb[1].mxu1 }
 0x234   : > { %v755_v41 = vadd.f32 %v754_v40, %v671_v37  ;;  %v1295_v42 = vpop.f32.mrb[2].mxu1 }
 0x235   : > { %v775_v43 = vmul.f32 0.01, %v763_v39  ;;  %v766_v44 = vadd.f32 %v1295_v42, %v671_v37  ;;  %v757_v45 = vpop.f32.mrb[3].mxu1  ;;  %vm771_vm2 = vcmp.gt.f32.partialorder %v763_v39, 0.0 }
 0x236   : > { %v773_v46 = vmul.f32 0.01, %v755_v41  ;;  %v758_v47 = vadd.f32 %v757_v45, %v671_v37  ;;  %vm769_vm3 = vcmp.gt.f32.partialorder %v755_v41, 0.0  ;;  %v598_v37 = vld [vmem:[%s511_s26] sm:$0x1] }
 0x237   : > { %vm772_vm4 = vcmp.gt.f32.partialorder %v766_v44, 0.0  ;;  %v776_v48 = vmul.f32 0.01, %v766_v44  ;;  %v779_v50 = vsel %vm771_vm2, %v763_v39, %v775_v43  ;;  %v1014_v38 = vunpack.c.l.bf16 %v598_v37  ;;  %v1031_v43 = vld [vmem:[#allocation3 + $0x10] sm:$0xff] }
 0x238   : > { %vm770_vm5 = vcmp.gt.f32.partialorder %v758_v47, 0.0  ;;  %v774_v49 = vmul.f32 0.01, %v758_v47  ;;  %v777_v53 = vsel %vm769_vm3, %v755_v41, %v773_v46  ;;  %v1029_v46 = vld [vmem:[#allocation3] sm:$0xff] }
 0x239   : > { %v780_v51 = vsel %vm772_vm4, %v766_v44, %v776_v48  ;;  %v1018_v39 = vrot.slane %v1014_v38, %v1879_v36  ;;  %v1030_v36 = vld [vmem:[#allocation3 + $0x8] sm:$0xff] }
 0x23a   : > { %v782_v52 = vpack.c.bf16 %v780_v51, %v779_v50  ;;  %v778_v54 = vsel %vm770_vm5, %v758_v47, %v774_v49 }
 0x23b   : > { %v781_v55 = vpack.c.bf16 %v778_v54, %v777_v53  ;;  %v1032_v53 = vld [vmem:[#allocation3 + $0x18] sm:$0xff] }
 0x23c   : > { %1028 = vst [vmem:[#allocation2 + $0x8] sm:$0xff] %v782_v52 }
 0x23d   : > { %1312 = vmatprep.mubr.bf16.mxu0 %v781_v55  ;;  %1027 = vst [vmem:[#allocation2] sm:$0xff] %v781_v55 }
 0x23e   : > { %1313 = vmatmul.mubr.bf16.vlgmr.msra.gmra.mrb[4].mxu0 %v782_v52 }
 0x311   : > { %v1314_v0 = vpop.f32.mrb[4].mxu0 }
 0x312   : > { %v879_v1 = vadd.f32 %v1314_v0, %v787_v63  ;;  %v870_v2 = vpop.f32.mrb[5].mxu0 }
 0x313   : > { %v871_v3 = vadd.f32 %v870_v2, %v787_v63  ;;  %v1315_v4 = vpop.f32.mrb[6].mxu0 }
 0x314   : > { %1416 = vtanh.f32 %v879_v1  ;;  %v882_v5 = vadd.f32 %v1315_v4, %v787_v63  ;;  %v873_v6 = vpop.f32.mrb[7].mxu0 }
 0x315   : > { %1418 = vtanh.f32 %v871_v3  ;;  %v874_v7 = vadd.f32 %v873_v6, %v787_v63 }
 0x316   : > { %1420 = vtanh.f32 %v882_v5 }
 0x317   : > { %1422 = vtanh.f32 %v874_v7 }
 0x31e   : > { %v1417_v8 = vpop.eup %1416 }
 0x31f   : > { %v1419_v9 = vpop.eup %1418 }
 0x320   : > { %v1421_v10 = vpop.eup %1420 }
 0x321   : > { %v1423_v11 = vpop.eup %1422  ;;  %v890_v12 = vpack.c.bf16 %v1421_v10, %v1417_v8 }
 0x322   : > { %v889_v13 = vpack.c.bf16 %v1423_v11, %v1419_v9 }
 0x324   : > { %1332 = vmatprep.mubr.bf16.mxu1 %v889_v13 }
 0x325   : > { %1333 = vmatmul.mubr.bf16.vlgmr.msra.gmra.mrb[4].mxu1 %v890_v12 }
 0x3f8   : > { %v1334_v17 = vpop.f32.mrb[4].mxu1 }
 0x3f9   : > { %v987_v18 = vadd.f32 %v1334_v17, %v895_v16  ;;  %v978_v19 = vpop.f32.mrb[5].mxu1 }
 0x3fa   : > { %v979_v20 = vadd.f32 %v978_v19, %v895_v16  ;;  %v1335_v21 = vpop.f32.mrb[6].mxu1 }
 0x3fb   : > { %1424 = vtanh.f32 %v987_v18  ;;  %v990_v22 = vadd.f32 %v1335_v21, %v895_v16  ;;  %v981_v23 = vpop.f32.mrb[7].mxu1 }
 0x3fc   : > { %1426 = vtanh.f32 %v979_v20  ;;  %v982_v25 = vadd.f32 %v981_v23, %v895_v16 }
 0x3fd   : > { %1428 = vtanh.f32 %v990_v22 }
 0x3fe   : > { %1430 = vtanh.f32 %v982_v25 }
 0x405   : > { %v1425_v28 = vpop.eup %1424 }
 0x406   : > { %v1427_v29 = vpop.eup %1426  ;;  %v1004_v30 = vmul.f32 %v1425_v28, %v1001_v27 }
 0x407   : > { %v1429_v31 = vpop.eup %1428  ;;  %v1002_v32 = vmul.f32 %v1427_v29, %v1001_v27 }
 0x408   : > { %v1431_v33 = vpop.eup %1430  ;;  %1010 = vadd.xlane.f32.xlu1 %v1004_v30  ;;  %v1005_v34 = vmul.f32 %v1429_v31, %v1001_v27 }
 0x409   : > { %1006 = vadd.xlane.f32.xlu0 %v1002_v32  ;;  %v1003_v35 = vmul.f32 %v1431_v33, %v1001_v27 }
 0x40c   : > { %1012 = vadd.xlane.f32.xlu1 %v1005_v34 }
 0x40d   : > { %1008 = vadd.xlane.f32.xlu0 %v1003_v35 }
 0x495   : > { %v1011_v40 = vpop.xlane.xlu1 %1010 }
 0x496   : > { %v1021_v41 = vadd.f32 %v1018_v39, %v1011_v40  ;;  %v1007_v42 = vpop.xlane.xlu0 %1006 }
 0x497   : > { %v1019_v44 = vadd.f32 %v1018_v39, %v1007_v42 }
 0x498   : > { %v1025_v45 = vand.u32 2147483647, %v1021_v41 }
 0x499   : > { %v1023_v47 = vand.u32 2147483647, %v1019_v44  ;;  %v1013_v48 = vpop.xlane.xlu1 %1012 }
 0x49a   : > { %v1035_v49 = vadd.f32 %v1031_v43, %v1025_v45  ;;  %v1022_v50 = vadd.f32 %v1018_v39, %v1013_v48  ;;  %v1009_v51 = vpop.xlane.xlu0 %1008 }
 0x49b   : > { %v1033_v52 = vadd.f32 %v1029_v46, %v1023_v47  ;;  %v1020_v54 = vadd.f32 %v1018_v39, %v1009_v51  ;;  %1045 = sbr.rel (%p1228_p7) target bundleno = 1196 (0x4ac), region = 80 }
 0x49c   : > { %1040 = vst.msk [vmem:[#allocation3 + $0x10] sm:$0xff] %vm1037_vm6, %v1035_v49  ;;  %v1026_v55 = vand.u32 2147483647, %v1022_v50 }
 0x49d   : > { %1038 = vst.msk [vmem:[#allocation3] sm:$0xff] %vm1037_vm6, %v1033_v52  ;;  %v1024_v56 = vand.u32 2147483647, %v1020_v54 }
 0x49e   : > { %v1036_v57 = vadd.f32 %v1032_v53, %v1026_v55 }
 0x49f   : > { %v1034_v58 = vadd.f32 %v1030_v36, %v1024_v56 }
 0x4a0   : > { %1041 = vst.msk [vmem:[#allocation3 + $0x18] sm:$0xff] %vm1037_vm6, %v1036_v57 }
 0x4a1   : > { %1039 = vst.msk [vmem:[#allocation3 + $0x8] sm:$0xff] %vm1037_vm6, %v1034_v58 }
 0x4a3   : > { %v1048_v60 = vld [vmem:[#allocation3 + $0x10] sm:$0xff] }
 0x4a4   : > { %v1046_v59 = vld [vmem:[#allocation3] sm:$0xff] }
 0x4a5   : > { %v1050_v62 = vmul.f32 %v1048_v60, %v1046_v59 }
 0x4a7   : > { %v1049_v63 = vld [vmem:[#allocation3 + $0x18] sm:$0xff]  ;;  %1052 = vst.msk [vmem:[%s1976_s10] sm:$0xff] %vm1037_vm6, %v1050_v62 }
 0x4a8   : > { %v1047_v61 = vld [vmem:[#allocation3 + $0x8] sm:$0xff] }
 0x4a9   : > { %v1051_v0 = vmul.f32 %v1049_v63, %v1047_v61 }
 0x4ab   : > { %1053 = vst.msk [vmem:[%s1976_s10 + $0x8] sm:$0xff] %vm1037_vm6, %v1051_v0 }
 0x4ac PF: > { %s1977_s16 = sld [smem:[#allocation11_spill]]  ;;  %s1978_s17 = sld [smem:[#allocation12_spill]] }
 0x4ad   : > { %s1979_s13 = smov %s1552_s14  ;;  %s1980_s14 = smov %s1556_s15 }
 0x4b2   : > { %p23_p9 = scmp.ge.s32.totalorder %s1977_s16, 7   ;;  %s1981_s15 = smov %s1978_s17 }
 0x4b4   :  { %25 = sbr.rel (!%p23_p9) target bundleno = 9 (0x9), region = 143 }
 0x4bb   :  { %1065 = vsyncpa [#allocation5], 1 }
 0x4bc   :  { %1067 = vsyncpa [#allocation5 + $0x1], 1 }
 0x4bd   :  { %1068 = vsyncpa [#allocation7], 1 }
 0x4be   :  { %1070 = vsyncpa [#allocation7 + $0x1], 1 }

</bundles_post_ra>
